<compile_context>
chip_gen: v5e
topology: v5e:2x2
jax: 0.10.0
libtpu: 0.0.40
codegen_flags: <defaults>
</compile_context>

<pallas_src>
import jax
import jax.numpy as jnp
import numpy as np
from jax.experimental import pallas as pl
from jax.experimental.pallas import tpu as pltpu


# ---------------------------------------------------------------------------
# Kernel: one tile of rows -> y = x @ W + b
# ---------------------------------------------------------------------------
def _affine_kernel(x_ref, w_ref, b_ref, o_ref):
    y = jnp.dot(x_ref[...], w_ref[...], preferred_element_type=jnp.float32)
    o_ref[...] = y + b_ref[...]          # (1, out_dim) broadcast bias


# ---------------------------------------------------------------------------
# Row-tile sizing: largest multiple of 8 rows that fits the VMEM budget.
# ---------------------------------------------------------------------------
def _choose_block_rows(n, in_dim, out_dim, x_itemsize, max_rows, budget_bytes):
    n_rounded = max(8, pl.cdiv(n, 8) * 8)
    bm = min(int(max_rows), n_rounded)
    bm = max(8, (bm // 8) * 8)

    def tile_bytes(rows):
        # x + out tiles are double-buffered by the pipeliner; W/bias also get
        # a second (dead) buffer by default, so account for it conservatively.
        io = 2 * rows * in_dim * x_itemsize + 2 * rows * out_dim * 4
        const = 2 * (in_dim * out_dim * x_itemsize + out_dim * 4)
        return io + const

    while bm > 8 and tile_bytes(bm) > budget_bytes:
        bm = max(8, ((bm // 2) // 8) * 8)
    return bm, tile_bytes(bm)


# ---------------------------------------------------------------------------
# Wrapper (parameter folding / padding / tiling in plain JAX)
# ---------------------------------------------------------------------------
def pca_apply(x, mean_, components_, explained_variance_, *,
              whiten=False, inverse=False, max_block_rows=2048,
              use_bf16=False):
    """Semantics of PCA.forward(x, inverse=...) from the PyTorch module."""
    K, D = components_.shape
    x = x.astype(jnp.float32)
    lead = x.shape[:-1]

    comp = components_.astype(jnp.float32)
    mean = mean_.astype(jnp.float32)
    var = explained_variance_.astype(jnp.float32)

    if inverse:
        assert x.shape[-1] == K
        in_dim, out_dim = K, D
        w = (jnp.sqrt(var)[:, None] * comp) if whiten else comp      # (K, D)
        b = mean.reshape(1, D)
    else:
        assert x.shape[-1] == D
        in_dim, out_dim = D, K
        w = comp.T                                                   # (D, K)
        b = -(mean @ comp.T)                                         # (K,)
        if whiten:
            inv_std = 1.0 / jnp.sqrt(var)
            w = w * inv_std[None, :]
            b = b * inv_std
        b = b.reshape(1, K)

    x2 = x.reshape(-1, in_dim)
    n = x2.shape[0]

    x_itemsize = 2 if use_bf16 else 4
    TILE_BUDGET = 24 * 1024 * 1024
    bm, tile_b = _choose_block_rows(n, in_dim, out_dim, x_itemsize,
                                    max_block_rows, TILE_BUDGET)

    n_pad = pl.cdiv(n, bm) * bm
    if n_pad != n:
        x2 = jnp.pad(x2, ((0, n_pad - n), (0, 0)))

    # Optional bf16 matmul inputs (f32 accumulate & output) to halve HBM reads.
    mm_dtype = jnp.bfloat16 if use_bf16 else jnp.float32
    x2 = x2.astype(mm_dtype)
    w = w.astype(mm_dtype)

    vmem_limit = int(min(64 * 1024 * 1024,
                         max(32 * 1024 * 1024, tile_b * 3 // 2)))

    cost = pl.CostEstimate(
        flops=2 * n_pad * in_dim * out_dim,
        transcendentals=0,
        bytes_accessed=(n_pad * in_dim * x_itemsize        # x read
                        + n_pad * out_dim * 4              # out write
                        + in_dim * out_dim * x_itemsize    # W
                        + out_dim * 4))                    # bias

    grid = (n_pad // bm,)
    out = pl.pallas_call(
        _affine_kernel,
        out_shape=jax.ShapeDtypeStruct((n_pad, out_dim), jnp.float32),
        grid_spec=pltpu.PrefetchScalarGridSpec(
            num_scalar_prefetch=0,
            grid=grid,
            in_specs=[
                pl.BlockSpec((bm, in_dim), lambda i: (i, 0)),       # x tile
                pl.BlockSpec((in_dim, out_dim), lambda i: (0, 0)),  # folded W
                pl.BlockSpec((1, out_dim), lambda i: (0, 0)),       # folded bias
            ],
            out_specs=pl.BlockSpec((bm, out_dim), lambda i: (i, 0)),
        ),
        compiler_params=pltpu.CompilerParams(
            dimension_semantics=("parallel",),
            vmem_limit_bytes=vmem_limit),
        cost_estimate=cost,
    )(x2, w, b)

    return out[:n].reshape(*lead, out_dim)


# ---------------------------------------------------------------------------
# Pure-JAX reference (mirrors the PyTorch forward exactly)
# ---------------------------------------------------------------------------
def pca_ref(x, mean_, components_, explained_variance_, *,
            whiten=False, inverse=False):
    x = x.astype(jnp.float32)
    if inverse:
        if whiten:
            x = x * jnp.sqrt(explained_variance_)
        x = jnp.matmul(x, components_)
        x = x + mean_
    else:
        x = x - mean_
        x = jnp.matmul(x, components_.T)
        if whiten:
            x = x / jnp.sqrt(explained_variance_)
    return x


if __name__ == "__main__":
    # Synthetic, deterministic PCA "fit" parameters.
    D = 32          # original feature dim
    K = 8           # n_components
    B, S = 2, 8     # leading dims of x

    key = jax.random.PRNGKey(0)
    k_m, k_c, k_v, k_x = jax.random.split(key, 4)

    mean_ = jax.random.normal(k_m, (D,), jnp.float32)
    # Orthonormal rows for components_ (like a real PCA basis).
    q, _ = jnp.linalg.qr(jax.random.normal(k_c, (D, D), jnp.float32))
    components_ = q[:K, :].astype(jnp.float32)                     # (K, D)
    explained_variance_ = (jnp.sort(
        jax.random.uniform(k_v, (K,), jnp.float32) + 0.1)[::-1])   # (K,) > 0
    whiten = True

    x = jax.random.normal(k_x, (B, S, D), jnp.float32)

    # Forward transform (f32 path).
    y = pca_apply(x, mean_, components_, explained_variance_,
                  whiten=whiten, inverse=False)
    y = jax.block_until_ready(y)
    y_ref = pca_ref(x, mean_, components_, explained_variance_,
                    whiten=whiten, inverse=False)
    np.testing.assert_allclose(np.asarray(y), np.asarray(y_ref),
                               rtol=1e-5, atol=1e-5)

    # Inverse transform (f32 path).
    xr = pca_apply(y, mean_, components_, explained_variance_,
                   whiten=whiten, inverse=True)
    xr = jax.block_until_ready(xr)
    xr_ref = pca_ref(y_ref, mean_, components_, explained_variance_,
                     whiten=whiten, inverse=True)
    np.testing.assert_allclose(np.asarray(xr), np.asarray(xr_ref),
                               rtol=1e-5, atol=1e-5)

    # Non-whitened forward/inverse paths.
    y_nw = pca_apply(x, mean_, components_, explained_variance_,
                     whiten=False, inverse=False)
    y_nw = jax.block_until_ready(y_nw)
    y_nw_ref = pca_ref(x, mean_, components_, explained_variance_,
                       whiten=False, inverse=False)
    np.testing.assert_allclose(np.asarray(y_nw), np.asarray(y_nw_ref),
                               rtol=1e-5, atol=1e-5)

    xr_nw = pca_apply(y_nw, mean_, components_, explained_variance_,
                      whiten=False, inverse=True)
    xr_nw = jax.block_until_ready(xr_nw)
    xr_nw_ref = pca_ref(y_nw_ref, mean_, components_, explained_variance_,
                        whiten=False, inverse=True)
    np.testing.assert_allclose(np.asarray(xr_nw), np.asarray(xr_nw_ref),
                               rtol=1e-5, atol=1e-5)

    # bf16 fast path smoke test (loose tolerance).
    y_bf = pca_apply(x, mean_, components_, explained_variance_,
                     whiten=whiten, inverse=False, use_bf16=True)
    y_bf = jax.block_until_ready(y_bf)
    np.testing.assert_allclose(np.asarray(y_bf), np.asarray(y_ref),
                               rtol=5e-2, atol=5e-2)

    assert y.shape == (B, S, K) and xr.shape == (B, S, D)
    print("KERNEL_OK")
</pallas_src>

<mosaic_0001>
module attributes {stable_mosaic.version = 11 : i64} {
  func.func @_affine_kernel(%arg0: i32, %arg1: memref<16x32xf32, #tpu.memory_space<vmem>>, %arg2: memref<32x8xf32, #tpu.memory_space<vmem>>, %arg3: memref<1x8xf32, #tpu.memory_space<vmem>>, %arg4: memref<16x8xf32, #tpu.memory_space<vmem>>) attributes {dimension_semantics = [#tpu.dimension_semantics<parallel>], iteration_bounds = array<i64: 1>, scalar_prefetch = 0 : i64, scratch_operands = 0 : i64, tpu.core_type = #tpu.core_type<tc>, window_params = [{transform_indices = @transform_0, window_bounds = array<i64: 16, 32>}, {pipeline_mode = #tpu.pipeline_mode<synchronous>, transform_indices = @transform_1, window_bounds = array<i64: 32, 8>}, {pipeline_mode = #tpu.pipeline_mode<synchronous>, transform_indices = @transform_2, window_bounds = array<i64: 1, 8>}, {transform_indices = @transform_3, window_bounds = array<i64: 16, 8>}]} {
    %c0 = arith.constant 0 : index
    %c0_0 = arith.constant 0 : index
    %0 = vector.load %arg1[%c0, %c0_0] : memref<16x32xf32, #tpu.memory_space<vmem>>, vector<16x32xf32>
    %c0_1 = arith.constant 0 : index
    %c0_2 = arith.constant 0 : index
    %1 = vector.load %arg2[%c0_1, %c0_2] : memref<32x8xf32, #tpu.memory_space<vmem>>, vector<32x8xf32>
    %cst = arith.constant dense<0.000000e+00> : vector<16x8xf32>
    %2 = tpu.matmul %0, %1, %cst {dimension_numbers = #tpu.dot_dimension_numbers<[1], [0], [0], [1], [0, 0, 1, 1], [], []>} : vector<16x32xf32>, vector<32x8xf32>, vector<16x8xf32> -> vector<16x8xf32>
    %c0_3 = arith.constant 0 : index
    %c0_4 = arith.constant 0 : index
    %3 = vector.load %arg3[%c0_3, %c0_4] : memref<1x8xf32, #tpu.memory_space<vmem>>, vector<1x8xf32>
    %4 = vector.broadcast %3 : vector<1x8xf32> to vector<16x8xf32>
    %5 = arith.addf %2, %4 : vector<16x8xf32>
    %c0_5 = arith.constant 0 : index
    %c0_6 = arith.constant 0 : index
    %6 = vector.load %arg4[%c0_5, %c0_6] : memref<16x8xf32, #tpu.memory_space<vmem>>, vector<16x8xf32>
    tpu.vector_store %arg4[%c0_5, %c0_6], %5 {strides = array<i32>} : memref<16x8xf32, #tpu.memory_space<vmem>>, vector<16x8xf32>,
    return
  }
  func.func @transform_0(%arg0: i32) -> (i32, i32) {
    %c0_i32 = arith.constant 0 : i32
    %c0_i32_0 = arith.constant 0 : i32
    return %arg0, %c0_i32 : i32, i32
  }
  func.func @transform_1(%arg0: i32) -> (i32, i32) {
    %c0_i32 = arith.constant 0 : i32
    %c0_i32_0 = arith.constant 0 : i32
    %c0_i32_1 = arith.constant 0 : i32
    return %c0_i32, %c0_i32_0 : i32, i32
  }
  func.func @transform_2(%arg0: i32) -> (i32, i32) {
    %c0_i32 = arith.constant 0 : i32
    %c0_i32_0 = arith.constant 0 : i32
    %c0_i32_1 = arith.constant 0 : i32
    return %c0_i32, %c0_i32_0 : i32, i32
  }
  func.func @transform_3(%arg0: i32) -> (i32, i32) {
    %c0_i32 = arith.constant 0 : i32
    %c0_i32_0 = arith.constant 0 : i32
    return %arg0, %c0_i32 : i32, i32
  }
}

</mosaic_0001>

<bundles_post_ra>
// kernel: tpu_custom_call.1
= control target key start
LH: loop header
LB: loop body
LE: loop exit
PB: predicated region body
PF: predicated region fallthrough
CT: control target
= control target key end

     0   :  { %vm24_vm0 = vcmask 261120   ;;  %vm54_vm1 = vcmask 64512   ;;  %s115_s1 = inlined_call_operand.vmem [shape: f32[32,8], index: 1, kind: input, shape index: {}]   ;;  %s116_s2 = inlined_call_operand.vmem [shape: f32[1,8], index: 2, kind: input, shape index: {}]   ;;  %s117_s0 = inlined_call_operand.vmem [shape: f32[16,32], index: 0, kind: input, shape index: {}]   ;;  %s118_s3 = inlined_call_operand.vmem [shape: f32[16,8], index: 3, kind: output, shape index: {}]  }
   0x1   :  { %v19_v0 = vld [vmem:[%s115_s1 + $0x18] sm:$0xff]  ;;  %v18_v1 = vld [vmem:[%s115_s1 + $0x10] sm:$0xff]  ;;  %v17_v2 = vld [vmem:[%s115_s1 + $0x8] sm:$0xff] }
   0x2   :  { %43 = vmatpush.msra.mxu0 %v19_v0  ;;  %63 = vmatpush.msra.mxu1 %v19_v0  ;;  %v16_v3 = vld [vmem:[%s115_s1] sm:$0xff]  ;;  %v15_v5 = vld [vmem:[%s117_s0 + $0x8] sm:$0xff] }
   0x3   :  { %v14_v4 = vld [vmem:[%s117_s0] sm:$0xff] }
   0x4   :  { %44 = vmatpush.msra.mxu0 %v18_v1  ;;  %64 = vmatpush.msra.mxu1 %v18_v1  ;;  %v67_v6 = vld [vmem:[%s116_s2] ss:$0 sm:$0xff] }
   0x6   :  { %45 = vmatpush.msra.mxu0 %v17_v2  ;;  %65 = vmatpush.msra.mxu1 %v17_v2 }
   0x8   :  { %46 = vmatpush.msra.mxu0 %v16_v3  ;;  %66 = vmatpush.msra.mxu1 %v16_v3 }
   0x9   :  { %61 = vmatmul.msk.f32.vlgmr.msra.gmra.mxu0 %vm24_vm0, %v14_v4  ;;  %62 = vmatmul.msk.f32.vlgmr.msra.gmra.mxu1 %vm24_vm0, %v15_v5 }
  0x86   :  { %v48_v7 = vpop.f32.mrf.mxu0  ;;  %v51_v8 = vpop.f32.mrf.mxu1 }
  0x87   :  { %v49_v9 = vadd.f32 %v67_v6, %v48_v7  ;;  %v52_v10 = vadd.f32 %v67_v6, %v51_v8 }
  0x89   :  { %55 = vst.msk [vmem:[%s118_s3] sm:$0xff] %vm54_vm1, %v49_v9 }
  0x8a   :  { %56 = vst.msk [vmem:[%s118_s3 + $0x8] sm:$0xff] %vm54_vm1, %v52_v10 }

</bundles_post_ra>
